<compile_context>
chip_gen: v7x
topology: tpu7x:2x2x1
jax: 0.10.0
libtpu: 0.0.40
codegen_flags: <defaults>
</compile_context>

<pallas_src>
import jax
import jax.numpy as jnp
from jax.experimental import pallas as pl
from jax.experimental.pallas import tpu as pltpu


def _round_up(n: int, m: int) -> int:
    return ((n + m - 1) // m) * m


def _pick_tile(total: int, cap: int) -> int:
    """Largest multiple of 8 that divides `total` and is <= cap, else `total` (full dim)."""
    best = None
    t = 8
    while t <= min(total, cap):
        if total % t == 0:
            best = t
        t += 8
    return best if best is not None else total


def rnn_recurrence_kernel(p_ref, h0_ref, wh_ref, out_ref, hfin_ref, h_scratch):
    """Serial RNN recurrence: h <- tanh(h @ W_h + P[t]) for Tc timesteps per grid step.

    p_ref    : (BT, Tc, Hp)  pre-projected inputs x @ W_x + b   (mxu dtype)
    h0_ref   : (BT, Hp)      initial hidden state               (f32)
    wh_ref   : (Hp, Hp)      recurrent weights, VMEM-resident   (mxu dtype)
    out_ref  : (BT, Tc, Hp)  hidden states for this chunk       (f32, batch-major)
    hfin_ref : (BT, Hp)      final hidden for this batch tile   (f32)
    h_scratch: VMEM (BT, Hp) f32 state carried across the time-chunk grid axis
    """
    c = pl.program_id(1)  # time-chunk index (sequential / "arbitrary" axis)

    @pl.when(c == 0)
    def _():
        h_scratch[...] = h0_ref[...].astype(jnp.float32)

    tc = p_ref.shape[1]
    wh = wh_ref[...]          # loaded once per chunk, stays resident
    h = h_scratch[...]        # f32 carried state
    for i in range(tc):       # static unroll: serial chain, one (BT,Hp)x(Hp,Hp) MXU matmul + tanh per step
        pre = jnp.dot(h.astype(wh.dtype), wh, preferred_element_type=jnp.float32)
        pre = pre + p_ref[:, i, :].astype(jnp.float32)
        h = jnp.tanh(pre)     # f32 tanh (safe on v5e: no bf16 EUP there)
        out_ref[:, i, :] = h.astype(out_ref.dtype)

    h_scratch[...] = h
    hfin_ref[...] = h.astype(hfin_ref.dtype)


def recurrent_forward(x, wx, wh, b, hidden=None, *, mxu_dtype=jnp.float32,
                      time_chunk_cap=64, batch_tile_cap=128):
    """Matches Recurrent.forward: returns (outputs, final_hidden).

    x : (batch, seq, input_dim) f32;  wx: (input_dim, H);  wh: (H, H);  b: (1, H)
    """
    batch, seq, _ = x.shape
    hidden_dim = wh.shape[0]
    if hidden is None:
        hidden = jnp.zeros((batch, hidden_dim), dtype=jnp.float32)

    # --- TPU-friendly padded shapes (lane-dense, (8,128)-aligned) ---
    batch_p = _round_up(batch, 8)
    hidden_p = _round_up(hidden_dim, 128)
    bt = _pick_tile(batch_p, batch_tile_cap)   # batch tile -> "parallel" axis (megacore on v7x)
    tc = _pick_tile(seq, time_chunk_cap)       # timesteps per grid step (amortize grid overhead)

    # --- Hoisted input projection: one big MXU matmul OUTSIDE the serial recurrence ---
    prec = jax.lax.Precision.HIGHEST if mxu_dtype == jnp.float32 else jax.lax.Precision.DEFAULT
    p = jnp.einsum(
        "bsi,ih->bsh", x.astype(mxu_dtype), wx.astype(mxu_dtype),
        preferred_element_type=jnp.float32, precision=prec,
    ) + b.astype(jnp.float32)                  # bias folded in once, not per grid step
    p = p.astype(mxu_dtype)
    # Zero padding is exact: padded hidden lanes stay 0 through tanh(0) == 0.
    p = jnp.pad(p, ((0, batch_p - batch), (0, 0), (0, hidden_p - hidden_dim)))

    wh_p = jnp.pad(wh, ((0, hidden_p - hidden_dim), (0, hidden_p - hidden_dim))).astype(mxu_dtype)
    h0_p = jnp.pad(hidden.astype(jnp.float32),
                   ((0, batch_p - batch), (0, hidden_p - hidden_dim)))

    grid = (batch_p // bt, seq // tc)

    out_p, hfin_p = pl.pallas_call(
        rnn_recurrence_kernel,
        out_shape=(
            jax.ShapeDtypeStruct((batch_p, seq, hidden_p), jnp.float32),
            jax.ShapeDtypeStruct((batch_p, hidden_p), jnp.float32),
        ),
        grid_spec=pltpu.PrefetchScalarGridSpec(
            num_scalar_prefetch=0,
            grid=grid,
            in_specs=[
                pl.BlockSpec((bt, tc, hidden_p), lambda bi, ci: (bi, ci, 0)),   # P chunk
                pl.BlockSpec((bt, hidden_p), lambda bi, ci: (bi, 0)),           # h0
                pl.BlockSpec((hidden_p, hidden_p), lambda bi, ci: (0, 0)),      # W_h (resident)
            ],
            out_specs=(
                pl.BlockSpec((bt, tc, hidden_p), lambda bi, ci: (bi, ci, 0)),   # hidden states
                pl.BlockSpec((bt, hidden_p), lambda bi, ci: (bi, 0)),           # final hidden
            ),
            scratch_shapes=[pltpu.VMEM((bt, hidden_p), jnp.float32)],
        ),
        compiler_params=pltpu.CompilerParams(
            # batch tiles are independent -> shardable across TensorCores (v7x);
            # the time-chunk axis is the serial recurrence -> must stay sequential.
            dimension_semantics=("parallel", "arbitrary"),
        ),
    )(p, h0_p, wh_p)

    outputs = out_p[:batch, :, :hidden_dim]
    final_hidden = hfin_p[:batch, :hidden_dim]
    # TODO(synk): for very large hidden_dim on v7x (64 MiB VMEM), tile W_h over a K grid axis
    # and set vmem_limit_bytes instead of keeping the full (Hp, Hp) weight resident.
    return outputs, final_hidden


def recurrent_forward_ref(x, wx, wh, b, hidden=None):
    """Pure-JAX reference mirroring the PyTorch loop."""
    batch, seq, _ = x.shape
    hidden_dim = wh.shape[0]
    if hidden is None:
        hidden = jnp.zeros((batch, hidden_dim), dtype=x.dtype)
    outs = []
    for i in range(seq):
        xi = x[:, i, :]
        combined = jnp.concatenate([xi, hidden], axis=1)
        hidden = jnp.tanh(combined @ jnp.concatenate([wx, wh], axis=0) + b)
        outs.append(hidden)
    return jnp.stack(outs, axis=1), hidden


if __name__ == "__main__":
    batch, seq, input_dim, hidden_dim = 2, 8, 16, 32

    key = jax.random.PRNGKey(0)
    kx, kwx, kwh, kb = jax.random.split(key, 4)

    x = jax.random.normal(kx, (batch, seq, input_dim), dtype=jnp.float32)
    # Deterministic "net" parameters: Linear(input_dim + hidden_dim -> hidden_dim) + tanh
    wx = jax.random.normal(kwx, (input_dim, hidden_dim), dtype=jnp.float32) * 0.1
    wh = jax.random.normal(kwh, (hidden_dim, hidden_dim), dtype=jnp.float32) * 0.1
    b = jax.random.normal(kb, (1, hidden_dim), dtype=jnp.float32) * 0.1

    ref_out, ref_h = recurrent_forward_ref(x, wx, wh, b)

    # f32 MXU-operand path: tight structural check.
    outputs, final_hidden = recurrent_forward(x, wx, wh, b, mxu_dtype=jnp.float32)
    outputs = jax.block_until_ready(outputs)
    final_hidden = jax.block_until_ready(final_hidden)
    assert outputs.shape == (batch, seq, hidden_dim)
    assert final_hidden.shape == (batch, hidden_dim)
    assert jnp.allclose(outputs, ref_out, atol=1e-5, rtol=1e-5)
    assert jnp.allclose(final_hidden, ref_h, atol=1e-5, rtol=1e-5)

    # bf16 MXU-operand path (v6e/v7x fast path; f32 accumulation + f32 tanh): loose tolerance.
    out_bf16, h_bf16 = recurrent_forward(x, wx, wh, b, mxu_dtype=jnp.bfloat16)
    out_bf16 = jax.block_until_ready(out_bf16)
    h_bf16 = jax.block_until_ready(h_bf16)
    assert jnp.allclose(out_bf16, ref_out, atol=5e-2, rtol=5e-2)
    assert jnp.allclose(h_bf16, ref_h, atol=5e-2, rtol=5e-2)

    print("KERNEL_OK")
</pallas_src>

<mosaic_0001>
module attributes {stable_mosaic.version = 11 : i64} {
  func.func @rnn_recurrence_kernel(%arg0: i32, %arg1: i32, %arg2: memref<8x8x128xf32, #tpu.memory_space<vmem>>, %arg3: memref<8x128xf32, #tpu.memory_space<vmem>>, %arg4: memref<128x128xf32, #tpu.memory_space<vmem>>, %arg5: memref<8x8x128xf32, #tpu.memory_space<vmem>>, %arg6: memref<8x128xf32, #tpu.memory_space<vmem>>, %arg7: memref<8x128xf32, #tpu.memory_space<vmem>>) attributes {dimension_semantics = [#tpu.dimension_semantics<parallel>, #tpu.dimension_semantics<arbitrary>], iteration_bounds = array<i64: 1, 1>, scalar_prefetch = 0 : i64, scratch_operands = 1 : i64, tpu.core_type = #tpu.core_type<tc>, window_params = [{transform_indices = @transform_0, window_bounds = array<i64: 8, 8, 128>}, {transform_indices = @transform_1, window_bounds = array<i64: 8, 128>}, {pipeline_mode = #tpu.pipeline_mode<synchronous>, transform_indices = @transform_2, window_bounds = array<i64: 128, 128>}, {transform_indices = @transform_3, window_bounds = array<i64: 8, 8, 128>}, {transform_indices = @transform_4, window_bounds = array<i64: 8, 128>}]} {
    %c0_i32 = arith.constant 0 : i32
    %0 = arith.cmpi eq, %arg1, %c0_i32 : i32
    %1 = arith.extui %0 : i1 to i32
    %c0_i32_0 = arith.constant 0 : i32
    %2 = arith.cmpi ne, %1, %c0_i32_0 : i32
    scf.if %2 {
      %c0_56 = arith.constant 0 : index
      %c0_57 = arith.constant 0 : index
      %71 = vector.load %arg3[%c0_56, %c0_57] : memref<8x128xf32, #tpu.memory_space<vmem>>, vector<8x128xf32>
      %c0_58 = arith.constant 0 : index
      %c0_59 = arith.constant 0 : index
      %72 = vector.load %arg7[%c0_58, %c0_59] : memref<8x128xf32, #tpu.memory_space<vmem>>, vector<8x128xf32>
      tpu.vector_store %arg7[%c0_58, %c0_59], %71 {strides = array<i32>} : memref<8x128xf32, #tpu.memory_space<vmem>>, vector<8x128xf32>,
    } else {
    }
    %c0 = arith.constant 0 : index
    %c0_1 = arith.constant 0 : index
    %3 = vector.load %arg4[%c0, %c0_1] : memref<128x128xf32, #tpu.memory_space<vmem>>, vector<128x128xf32>
    %c0_2 = arith.constant 0 : index
    %c0_3 = arith.constant 0 : index
    %4 = vector.load %arg7[%c0_2, %c0_3] : memref<8x128xf32, #tpu.memory_space<vmem>>, vector<8x128xf32>
    %cst = arith.constant dense<0.000000e+00> : vector<8x128xf32>
    %5 = tpu.matmul %4, %3, %cst {dimension_numbers = #tpu.dot_dimension_numbers<[1], [0], [0], [1], [0, 0, 1, 1], [], []>} : vector<8x128xf32>, vector<128x128xf32>, vector<8x128xf32> -> vector<8x128xf32>
    %c0_4 = arith.constant 0 : index
    %c0_5 = arith.constant 0 : index
    %c0_6 = arith.constant 0 : index
    %6 = vector.load %arg2[%c0_4, %c0_5, %c0_6] : memref<8x8x128xf32, #tpu.memory_space<vmem>>, vector<8x1x128xf32>
    %7 = vector.shape_cast %6 : vector<8x1x128xf32> to vector<8x128xf32>
    %8 = arith.addf %5, %7 : vector<8x128xf32>
    %9 = math.tanh %8 : vector<8x128xf32>
    %c0_7 = arith.constant 0 : index
    %c0_8 = arith.constant 0 : index
    %c0_9 = arith.constant 0 : index
    %10 = vector.load %arg5[%c0_7, %c0_8, %c0_9] : memref<8x8x128xf32, #tpu.memory_space<vmem>>, vector<8x1x128xf32>
    %11 = vector.shape_cast %10 : vector<8x1x128xf32> to vector<8x128xf32>
    %12 = vector.shape_cast %9 : vector<8x128xf32> to vector<8x1x128xf32>
    tpu.vector_store %arg5[%c0_7, %c0_8, %c0_9], %12 {strides = array<i32>} : memref<8x8x128xf32, #tpu.memory_space<vmem>>, vector<8x1x128xf32>,
    %cst_10 = arith.constant dense<0.000000e+00> : vector<8x128xf32>
    %13 = tpu.matmul %9, %3, %cst_10 {dimension_numbers = #tpu.dot_dimension_numbers<[1], [0], [0], [1], [0, 0, 1, 1], [], []>} : vector<8x128xf32>, vector<128x128xf32>, vector<8x128xf32> -> vector<8x128xf32>
    %c0_11 = arith.constant 0 : index
    %c1 = arith.constant 1 : index
    %c0_12 = arith.constant 0 : index
    %14 = vector.load %arg2[%c0_11, %c1, %c0_12] : memref<8x8x128xf32, #tpu.memory_space<vmem>>, vector<8x1x128xf32>
    %15 = vector.shape_cast %14 : vector<8x1x128xf32> to vector<8x128xf32>
    %16 = arith.addf %13, %15 : vector<8x128xf32>
    %17 = math.tanh %16 : vector<8x128xf32>
    %c0_13 = arith.constant 0 : index
    %c1_14 = arith.constant 1 : index
    %c0_15 = arith.constant 0 : index
    %18 = vector.load %arg5[%c0_13, %c1_14, %c0_15] : memref<8x8x128xf32, #tpu.memory_space<vmem>>, vector<8x1x128xf32>
    %19 = vector.shape_cast %18 : vector<8x1x128xf32> to vector<8x128xf32>
    %20 = vector.shape_cast %17 : vector<8x128xf32> to vector<8x1x128xf32>
    tpu.vector_store %arg5[%c0_13, %c1_14, %c0_15], %20 {strides = array<i32>} : memref<8x8x128xf32, #tpu.memory_space<vmem>>, vector<8x1x128xf32>,
    %cst_16 = arith.constant dense<0.000000e+00> : vector<8x128xf32>
    %21 = tpu.matmul %17, %3, %cst_16 {dimension_numbers = #tpu.dot_dimension_numbers<[1], [0], [0], [1], [0, 0, 1, 1], [], []>} : vector<8x128xf32>, vector<128x128xf32>, vector<8x128xf32> -> vector<8x128xf32>
    %c0_17 = arith.constant 0 : index
    %c2 = arith.constant 2 : index
    %c0_18 = arith.constant 0 : index
    %22 = vector.load %arg2[%c0_17, %c2, %c0_18] : memref<8x8x128xf32, #tpu.memory_space<vmem>>, vector<8x1x128xf32>
    %23 = vector.shape_cast %22 : vector<8x1x128xf32> to vector<8x128xf32>
    %24 = arith.addf %21, %23 : vector<8x128xf32>
    %25 = math.tanh %24 : vector<8x128xf32>
    %c0_19 = arith.constant 0 : index
    %c2_20 = arith.constant 2 : index
    %c0_21 = arith.constant 0 : index
    %26 = vector.load %arg5[%c0_19, %c2_20, %c0_21] : memref<8x8x128xf32, #tpu.memory_space<vmem>>, vector<8x1x128xf32>
    %27 = vector.shape_cast %26 : vector<8x1x128xf32> to vector<8x128xf32>
    %28 = vector.shape_cast %25 : vector<8x128xf32> to vector<8x1x128xf32>
    tpu.vector_store %arg5[%c0_19, %c2_20, %c0_21], %28 {strides = array<i32>} : memref<8x8x128xf32, #tpu.memory_space<vmem>>, vector<8x1x128xf32>,
    %cst_22 = arith.constant dense<0.000000e+00> : vector<8x128xf32>
    %29 = tpu.matmul %25, %3, %cst_22 {dimension_numbers = #tpu.dot_dimension_numbers<[1], [0], [0], [1], [0, 0, 1, 1], [], []>} : vector<8x128xf32>, vector<128x128xf32>, vector<8x128xf32> -> vector<8x128xf32>
    %c0_23 = arith.constant 0 : index
    %c3 = arith.constant 3 : index
    %c0_24 = arith.constant 0 : index
    %30 = vector.load %arg2[%c0_23, %c3, %c0_24] : memref<8x8x128xf32, #tpu.memory_space<vmem>>, vector<8x1x128xf32>
    %31 = vector.shape_cast %30 : vector<8x1x128xf32> to vector<8x128xf32>
    %32 = arith.addf %29, %31 : vector<8x128xf32>
    %33 = math.tanh %32 : vector<8x128xf32>
    %c0_25 = arith.constant 0 : index
    %c3_26 = arith.constant 3 : index
    %c0_27 = arith.constant 0 : index
    %34 = vector.load %arg5[%c0_25, %c3_26, %c0_27] : memref<8x8x128xf32, #tpu.memory_space<vmem>>, vector<8x1x128xf32>
    %35 = vector.shape_cast %34 : vector<8x1x128xf32> to vector<8x128xf32>
    %36 = vector.shape_cast %33 : vector<8x128xf32> to vector<8x1x128xf32>
    tpu.vector_store %arg5[%c0_25, %c3_26, %c0_27], %36 {strides = array<i32>} : memref<8x8x128xf32, #tpu.memory_space<vmem>>, vector<8x1x128xf32>,
    %cst_28 = arith.constant dense<0.000000e+00> : vector<8x128xf32>
    %37 = tpu.matmul %33, %3, %cst_28 {dimension_numbers = #tpu.dot_dimension_numbers<[1], [0], [0], [1], [0, 0, 1, 1], [], []>} : vector<8x128xf32>, vector<128x128xf32>, vector<8x128xf32> -> vector<8x128xf32>
    %c0_29 = arith.constant 0 : index
    %c4 = arith.constant 4 : index
    %c0_30 = arith.constant 0 : index
    %38 = vector.load %arg2[%c0_29, %c4, %c0_30] : memref<8x8x128xf32, #tpu.memory_space<vmem>>, vector<8x1x128xf32>
    %39 = vector.shape_cast %38 : vector<8x1x128xf32> to vector<8x128xf32>
    %40 = arith.addf %37, %39 : vector<8x128xf32>
    %41 = math.tanh %40 : vector<8x128xf32>
    %c0_31 = arith.constant 0 : index
    %c4_32 = arith.constant 4 : index
    %c0_33 = arith.constant 0 : index
    %42 = vector.load %arg5[%c0_31, %c4_32, %c0_33] : memref<8x8x128xf32, #tpu.memory_space<vmem>>, vector<8x1x128xf32>
    %43 = vector.shape_cast %42 : vector<8x1x128xf32> to vector<8x128xf32>
    %44 = vector.shape_cast %41 : vector<8x128xf32> to vector<8x1x128xf32>
    tpu.vector_store %arg5[%c0_31, %c4_32, %c0_33], %44 {strides = array<i32>} : memref<8x8x128xf32, #tpu.memory_space<vmem>>, vector<8x1x128xf32>,
    %cst_34 = arith.constant dense<0.000000e+00> : vector<8x128xf32>
    %45 = tpu.matmul %41, %3, %cst_34 {dimension_numbers = #tpu.dot_dimension_numbers<[1], [0], [0], [1], [0, 0, 1, 1], [], []>} : vector<8x128xf32>, vector<128x128xf32>, vector<8x128xf32> -> vector<8x128xf32>
    %c0_35 = arith.constant 0 : index
    %c5 = arith.constant 5 : index
    %c0_36 = arith.constant 0 : index
    %46 = vector.load %arg2[%c0_35, %c5, %c0_36] : memref<8x8x128xf32, #tpu.memory_space<vmem>>, vector<8x1x128xf32>
    %47 = vector.shape_cast %46 : vector<8x1x128xf32> to vector<8x128xf32>
    %48 = arith.addf %45, %47 : vector<8x128xf32>
    %49 = math.tanh %48 : vector<8x128xf32>
    %c0_37 = arith.constant 0 : index
    %c5_38 = arith.constant 5 : index
    %c0_39 = arith.constant 0 : index
    %50 = vector.load %arg5[%c0_37, %c5_38, %c0_39] : memref<8x8x128xf32, #tpu.memory_space<vmem>>, vector<8x1x128xf32>
    %51 = vector.shape_cast %50 : vector<8x1x128xf32> to vector<8x128xf32>
    %52 = vector.shape_cast %49 : vector<8x128xf32> to vector<8x1x128xf32>
    tpu.vector_store %arg5[%c0_37, %c5_38, %c0_39], %52 {strides = array<i32>} : memref<8x8x128xf32, #tpu.memory_space<vmem>>, vector<8x1x128xf32>,
    %cst_40 = arith.constant dense<0.000000e+00> : vector<8x128xf32>
    %53 = tpu.matmul %49, %3, %cst_40 {dimension_numbers = #tpu.dot_dimension_numbers<[1], [0], [0], [1], [0, 0, 1, 1], [], []>} : vector<8x128xf32>, vector<128x128xf32>, vector<8x128xf32> -> vector<8x128xf32>
    %c0_41 = arith.constant 0 : index
    %c6 = arith.constant 6 : index
    %c0_42 = arith.constant 0 : index
    %54 = vector.load %arg2[%c0_41, %c6, %c0_42] : memref<8x8x128xf32, #tpu.memory_space<vmem>>, vector<8x1x128xf32>
    %55 = vector.shape_cast %54 : vector<8x1x128xf32> to vector<8x128xf32>
    %56 = arith.addf %53, %55 : vector<8x128xf32>
    %57 = math.tanh %56 : vector<8x128xf32>
    %c0_43 = arith.constant 0 : index
    %c6_44 = arith.constant 6 : index
    %c0_45 = arith.constant 0 : index
    %58 = vector.load %arg5[%c0_43, %c6_44, %c0_45] : memref<8x8x128xf32, #tpu.memory_space<vmem>>, vector<8x1x128xf32>
    %59 = vector.shape_cast %58 : vector<8x1x128xf32> to vector<8x128xf32>
    %60 = vector.shape_cast %57 : vector<8x128xf32> to vector<8x1x128xf32>
    tpu.vector_store %arg5[%c0_43, %c6_44, %c0_45], %60 {strides = array<i32>} : memref<8x8x128xf32, #tpu.memory_space<vmem>>, vector<8x1x128xf32>,
    %cst_46 = arith.constant dense<0.000000e+00> : vector<8x128xf32>
    %61 = tpu.matmul %57, %3, %cst_46 {dimension_numbers = #tpu.dot_dimension_numbers<[1], [0], [0], [1], [0, 0, 1, 1], [], []>} : vector<8x128xf32>, vector<128x128xf32>, vector<8x128xf32> -> vector<8x128xf32>
    %c0_47 = arith.constant 0 : index
    %c7 = arith.constant 7 : index
    %c0_48 = arith.constant 0 : index
    %62 = vector.load %arg2[%c0_47, %c7, %c0_48] : memref<8x8x128xf32, #tpu.memory_space<vmem>>, vector<8x1x128xf32>
    %63 = vector.shape_cast %62 : vector<8x1x128xf32> to vector<8x128xf32>
    %64 = arith.addf %61, %63 : vector<8x128xf32>
    %65 = math.tanh %64 : vector<8x128xf32>
    %c0_49 = arith.constant 0 : index
    %c7_50 = arith.constant 7 : index
    %c0_51 = arith.constant 0 : index
    %66 = vector.load %arg5[%c0_49, %c7_50, %c0_51] : memref<8x8x128xf32, #tpu.memory_space<vmem>>, vector<8x1x128xf32>
    %67 = vector.shape_cast %66 : vector<8x1x128xf32> to vector<8x128xf32>
    %68 = vector.shape_cast %65 : vector<8x128xf32> to vector<8x1x128xf32>
    tpu.vector_store %arg5[%c0_49, %c7_50, %c0_51], %68 {strides = array<i32>} : memref<8x8x128xf32, #tpu.memory_space<vmem>>, vector<8x1x128xf32>,
    %c0_52 = arith.constant 0 : index
    %c0_53 = arith.constant 0 : index
    %69 = vector.load %arg7[%c0_52, %c0_53] : memref<8x128xf32, #tpu.memory_space<vmem>>, vector<8x128xf32>
    tpu.vector_store %arg7[%c0_52, %c0_53], %65 {strides = array<i32>} : memref<8x128xf32, #tpu.memory_space<vmem>>, vector<8x128xf32>,
    %c0_54 = arith.constant 0 : index
    %c0_55 = arith.constant 0 : index
    %70 = vector.load %arg6[%c0_54, %c0_55] : memref<8x128xf32, #tpu.memory_space<vmem>>, vector<8x128xf32>
    tpu.vector_store %arg6[%c0_54, %c0_55], %65 {strides = array<i32>} : memref<8x128xf32, #tpu.memory_space<vmem>>, vector<8x128xf32>,
    return
  }
  func.func @transform_0(%arg0: i32, %arg1: i32) -> (i32, i32, i32) {
    %c0_i32 = arith.constant 0 : i32
    %c0_i32_0 = arith.constant 0 : i32
    return %arg0, %arg1, %c0_i32 : i32, i32, i32
  }
  func.func @transform_1(%arg0: i32, %arg1: i32) -> (i32, i32) {
    %c0_i32 = arith.constant 0 : i32
    %c0_i32_0 = arith.constant 0 : i32
    return %arg0, %c0_i32 : i32, i32
  }
  func.func @transform_2(%arg0: i32, %arg1: i32) -> (i32, i32) {
    %c0_i32 = arith.constant 0 : i32
    %c0_i32_0 = arith.constant 0 : i32
    %c0_i32_1 = arith.constant 0 : i32
    return %c0_i32, %c0_i32_0 : i32, i32
  }
  func.func @transform_3(%arg0: i32, %arg1: i32) -> (i32, i32, i32) {
    %c0_i32 = arith.constant 0 : i32
    %c0_i32_0 = arith.constant 0 : i32
    return %arg0, %arg1, %c0_i32 : i32, i32, i32
  }
  func.func @transform_4(%arg0: i32, %arg1: i32) -> (i32, i32) {
    %c0_i32 = arith.constant 0 : i32
    %c0_i32_0 = arith.constant 0 : i32
    return %arg0, %c0_i32 : i32, i32
  }
}

</mosaic_0001>

<bundles_post_ra>
// kernel: tpu_custom_call.1
= control target key start
LH: loop header
LB: loop body
LE: loop exit
PB: predicated region body
PF: predicated region fallthrough
CT: control target
= control target key end

     0   :  { %10 = vsyncpa [#allocation4], 0  ;;  %s2628_s0 = inlined_call_operand.hbm [shape: f32[8,8,128], index: 0, kind: input, shape index: {}]   ;;  %s2629_s1 = inlined_call_operand.hbm [shape: f32[8,128], index: 1, kind: input, shape index: {}]   ;;  %s2630_s2 = inlined_call_operand.hbm [shape: f32[128,128], index: 2, kind: input, shape index: {}]   ;;  %s2631_s3 = inlined_call_operand.hbm [shape: f32[8,8,128], index: 3, kind: output, shape index: {0}]   ;;  %s2632_s4 = inlined_call_operand.hbm [shape: f32[8,128], index: 4, kind: output, shape index: {1}]  }
   0x1   :  { %11 = vsyncpa [#allocation7], 0 }
   0x2   :  { %12 = vsyncpa [#allocation5], 0 }
   0x3   :  { %13 = vsyncpa [#allocation11], 0  ;;  %s2250_s15 = smov [#allocation6]   ;;  %s2251_s17 = smov [#allocation3]  }
   0x4   :  { %s32_s16 = sshll.u32 %s2250_s15, 4  ;;  %s19_s18 = sshll.u32 %s2251_s17, 4  ;;  %s33_s16 = int_to_ptr.vmem [resolvable:$true] %s32_s16  ;;  %s2286_s18 = int_to_ptr.vmem [resolvable:$true] %s19_s18 }
   0x5   :  { %s2132_s21 = scalar_lea.hbm %s2629_s1, 128 }
   0x6   :  { %p2133_p0 = scmp.ne.s32.totalorder %s2629_s1, %s2132_s21  ;;  %p2136_p1 = scmp.lt.u32.totalorder %s2132_s21, %s2629_s1 }
   0x8   :  { %p2138_p2 = pnand %p2136_p1, %p2133_p0 }
   0xa   :  { %2141 = shalt.err (!%p2138_p2)
}
   0xb   :  { %s2142_s26 = scalar_lea.vmem %s33_s16, 128  ;;  %p2147_p4 = scmp.lt.s32.totalorder %s33_s16, %s33_s16 }
   0xc   :  { %p2143_p3 = scmp.ne.s32.totalorder %s33_s16, %s2142_s26  ;;  %p2148_p5 = scmp.lt.s32.totalorder %s2142_s26, %s2142_s26 }
   0xe   :  { %p2149_p6 = por %p2148_p5, %p2147_p4 }
  0x10   :  { %p2150_p7 = pnand %p2149_p6, %p2143_p3 }
  0x12   :  { %2153 = shalt.err (!%p2150_p7)
}
  0x13   :  { %35 = dma.hbm_to_vmem [thread:$0]  %s2629_s1, 128, %s33_s16, [#allocation7]  }
  0x14   :  { %s2154_s5 = scalar_lea.hbm %s2628_s0, 1024 }
  0x15   :  { %p2155_p8 = scmp.ne.s32.totalorder %s2628_s0, %s2154_s5  ;;  %p2158_p9 = scmp.lt.u32.totalorder %s2154_s5, %s2628_s0 }
  0x17   :  { %p2160_p10 = pnand %p2158_p9, %p2155_p8 }
  0x19   :  { %2163 = shalt.err (!%p2160_p10)
}
  0x1a   :  { %s2164_s10 = scalar_lea.vmem %s2286_s18, 1024  ;;  %p2169_p12 = scmp.lt.s32.totalorder %s2286_s18, %s2286_s18 }
  0x1b   :  { %p2165_p11 = scmp.ne.s32.totalorder %s2286_s18, %s2164_s10  ;;  %p2170_p13 = scmp.lt.s32.totalorder %s2164_s10, %s2164_s10 }
  0x1d   :  { %p2171_p0 = por %p2170_p13, %p2169_p12 }
  0x1f   :  { %p2172_p1 = pnand %p2171_p0, %p2165_p11 }
  0x21   :  { %2175 = shalt.err (!%p2172_p1)
}
  0x22   :  { %s2252_s1 = smov 128   ;;  %s2253_s11 = smov 8  }
  0x23   :  { %25 = dma.hbm_to_vmem [thread:$0]  %s2628_s0, 1024, %s2286_s18, [#allocation4], %s2252_s1, %s2252_s1, %s2253_s11  }
  0x24   :  { %s2254_s14 = smov [#allocation8]   ;;  %s2176_s19 = scalar_lea.hbm %s2630_s2, 2048 }
  0x25   :  { %s41_s15 = sshll.u32 %s2254_s14, 4  ;;  %p2177_p2 = scmp.ne.s32.totalorder %s2630_s2, %s2176_s19  ;;  %s42_s15 = int_to_ptr.vmem [resolvable:$true] %s41_s15 }
  0x26   :  { %p2180_p3 = scmp.lt.u32.totalorder %s2176_s19, %s2630_s2 }
  0x28   :  { %p2182_p4 = pnand %p2180_p3, %p2177_p2 }
  0x2a   :  { %2185 = shalt.err (!%p2182_p4)
}
  0x2b   :  { %s2186_s24 = scalar_lea.vmem %s42_s15, 2048  ;;  %p2191_p6 = scmp.lt.s32.totalorder %s42_s15, %s42_s15 }
  0x2c   :  { %p2187_p5 = scmp.ne.s32.totalorder %s42_s15, %s2186_s24  ;;  %p2192_p7 = scmp.lt.s32.totalorder %s2186_s24, %s2186_s24 }
  0x2e   :  { %p2193_p8 = por %p2192_p7, %p2191_p6 }
  0x30   :  { %p2194_p9 = pnand %p2193_p8, %p2187_p5 }
  0x32   :  { %2197 = shalt.err (!%p2194_p9)
}
  0x33   :  { %47 = dma.hbm_to_vmem [thread:$0]  %s2630_s2, 2048, %s42_s15, [#allocation7], %s2252_s1, %s2252_s1, %s2253_s11  }
  0x34   :  { %2242 = dma.done.wait [#allocation4], 1024  }
  0x35   :  { %2243 = vsyncadd [#allocation4], 4294966272 }
  0x36   :  { %2244 = dma.done.wait [#allocation7], 2176  }
  0x37   :  { %2245 = vsyncadd [#allocation7], 4294965120  ;;  %v2255_v0 = vmov 0.0|0.0   ;;  %vm2256_vm0 = vmmov 0   ;;  %v2257_v1 = vmov 0.0   ;;  %v63_v2 = vld [vmem:[#allocation8] sm:$0xff]  ;;  %v194_v54 = vlaneseq }
  0x38   :  { %1913 = vmatprep.subr.bf16.mxu0 %v2255_v0  ;;  %1665 = vmatprep.mubr.msk.f32.mxu0 %vm2256_vm0, %v2257_v1  ;;  %v64_v3 = vld [vmem:[#allocation8 + $0x8] sm:$0xff]  ;;  %v65_v4 = vld [vmem:[#allocation8 + $0x10] sm:$0xff]  ;;  %v66_v6 = vld [vmem:[#allocation8 + $0x18] sm:$0xff]  ;;  %vm97_vm1 = vcmask 1041409   ;;  %vm100_vm2 = vcmask 1042434   ;;  %vm103_vm3 = vcmask 1043459  }
  0x39   :  { %1937 = vmatprep.subr.bf16.mxu1 %v2255_v0  ;;  %1700 = vmatprep.mubr.msk.f32.mxu1 %vm2256_vm0, %v2257_v1  ;;  %v2341_v5 = vpack.c.bf16 %v64_v3, %v63_v2  ;;  %v2344_v7 = vpack.c.bf16 %v66_v6, %v65_v4  ;;  %v67_v8 = vld [vmem:[#allocation8 + $0x20] sm:$0xff]  ;;  %v68_v9 = vld [vmem:[#allocation8 + $0x28] sm:$0xff]  ;;  %v69_v11 = vld [vmem:[#allocation8 + $0x30] sm:$0xff]  ;;  %vm106_vm4 = vcmask 1044484   ;;  %vm109_vm5 = vcmask 1045509   ;;  %s2259_s2 = smov [#allocation10]  }
  0x3a   :  { %v2350_v10 = vpack.c.bf16 %v68_v9, %v67_v8  ;;  %v70_v12 = vld [vmem:[#allocation8 + $0x38] sm:$0xff]  ;;  %v71_v14 = vld [vmem:[#allocation8 + $0x40] sm:$0xff]  ;;  %v72_v15 = vld [vmem:[#allocation8 + $0x48] sm:$0xff]  ;;  %vm112_vm6 = vcmask 1046534   ;;  %vm115_vm7 = vcmask 1047559   ;;  %v195_v56 = vshrl.u32 %v194_v54, 7 }
  0x3b   :  { %1915 = vmatpush3.bf16.msra.mxu0 %v2341_v5  ;;  %1939 = vmatpush3.bf16.msra.mxu1 %v2341_v5  ;;  %v2356_v13 = vpack.c.bf16 %v70_v12, %v69_v11  ;;  %v2362_v16 = vpack.c.bf16 %v72_v15, %v71_v14  ;;  %v73_v17 = vld [vmem:[#allocation8 + $0x50] sm:$0xff]  ;;  %v74_v18 = vld [vmem:[#allocation8 + $0x58] sm:$0xff]  ;;  %v75_v20 = vld [vmem:[#allocation8 + $0x60] sm:$0xff]  ;;  %v2258_v52 = vmov 1966171168   ;;  %s1451_s25 = sshll.u32 %s2259_s2, 4  ;;  %s1452_s25 = int_to_ptr.vmem [resolvable:$true] %s1451_s25 }
  0x3c   :  { %1916 = vmatprep.subr.bf16.mxu0 %v2255_v0  ;;  %1940 = vmatprep.subr.bf16.mxu1 %v2255_v0  ;;  %v2368_v19 = vpack.c.bf16 %v74_v18, %v73_v17  ;;  %v76_v21 = vld [vmem:[#allocation8 + $0x68] sm:$0xff]  ;;  %v77_v23 = vld [vmem:[#allocation8 + $0x70] sm:$0xff]  ;;  %v78_v24 = vld [vmem:[#allocation8 + $0x78] sm:$0xff]  ;;  %v192_v53 = vunpack.c.l.s4 %v2258_v52  ;;  %s2198_s26 = scalar_lea.vmem %s1452_s25, 128  ;;  %p2203_p11 = scmp.lt.s32.totalorder %s1452_s25, %s1452_s25 }
  0x3d   :  { %v2374_v22 = vpack.c.bf16 %v76_v21, %v75_v20  ;;  %v2380_v25 = vpack.c.bf16 %v78_v24, %v77_v23  ;;  %v61_v26 = vld [vmem:[#allocation6] sm:$0xff]  ;;  %v81_v27 = vld [vmem:[#allocation3 + $0x8] sm:$0x1]  ;;  %v82_v28 = vld [vmem:[#allocation3 + $0x10] sm:$0x1]  ;;  %p2199_p10 = scmp.ne.s32.totalorder %s1452_s25, %s2198_s26  ;;  %p2204_p12 = scmp.lt.s32.totalorder %s2198_s26, %s2198_s26 }
  0x3e   :  { %v96_v29 = vrot.slane %v81_v27, 7  ;;  %v80_v30 = vld [vmem:[#allocation3] sm:$0x1]  ;;  %v83_v31 = vld [vmem:[#allocation3 + $0x18] sm:$0x1]  ;;  %v99_v32 = vrot.slane %v82_v28, 6  ;;  %v193_v55 = vunpack.c.0.s8 %v192_v53 }
  0x3f   :  { %1918 = vmatpush3.bf16.msra.mxu0 %v2344_v7  ;;  %1942 = vmatpush3.bf16.msra.mxu1 %v2344_v7  ;;  %v84_v34 = vld [vmem:[#allocation3 + $0x20] sm:$0x1]  ;;  %v102_v35 = vrot.slane %v83_v31, 5  ;;  %v85_v37 = vld [vmem:[#allocation3 + $0x28] sm:$0x1]  ;;  %p2205_p13 = por %p2204_p12, %p2203_p11 }
  0x40   :  { %1919 = vmatprep.subr.bf16.mxu0 %v2255_v0  ;;  %1943 = vmatprep.subr.bf16.mxu1 %v2255_v0  ;;  %v98_v33 = vsel %vm97_vm1, %v96_v29, %v80_v30  ;;  %v105_v38 = vrot.slane %v84_v34, 4  ;;  %v86_v40 = vld [vmem:[#allocation3 + $0x30] sm:$0x1]  ;;  %v108_v41 = vrot.slane %v85_v37, 3  ;;  %v87_v43 = vld [vmem:[#allocation3 + $0x38] sm:$0x1]  ;;  %v2414_v57 = vsub.s32 %v193_v55, %v195_v56 }
  0x41   :  { %v101_v36 = vsel %vm100_vm2, %v99_v32, %v98_v33  ;;  %v111_v44 = vrot.slane %v86_v40, 2  ;;  %v114_v46 = vrot.slane %v87_v43, 1  ;;  %v256_v14 = vld [vmem:[#allocation3 + $0x9] sm:$0x1]  ;;  %v257_v15 = vld [vmem:[#allocation3 + $0x11] sm:$0x1]  ;;  %p2206_p0 = pnand %p2205_p13, %p2199_p10 }
  0x42   :  { %v104_v39 = vsel %vm103_vm3, %v102_v35, %v101_v36  ;;  %v271_v17 = vrot.slane %v256_v14, 7  ;;  %v255_v18 = vld [vmem:[#allocation3 + $0x1] sm:$0x1]  ;;  %v258_v20 = vld [vmem:[#allocation3 + $0x19] sm:$0x1]  ;;  %v273_v21 = vrot.slane %v257_v15, 6 }
  0x43   :  { %1921 = vmatpush3.bf16.msra.mxu0 %v2350_v10  ;;  %1945 = vmatpush3.bf16.msra.mxu1 %v2350_v10  ;;  %v107_v42 = vsel %vm106_vm4, %v105_v38, %v104_v39  ;;  %v259_v24 = vld [vmem:[#allocation3 + $0x21] sm:$0x1]  ;;  %v260_v28 = vld [vmem:[#allocation3 + $0x29] sm:$0x1]  ;;  %v261_v31 = vld [vmem:[#allocation3 + $0x31] sm:$0x1] }
  0x44   :  { %1922 = vmatprep.subr.bf16.mxu0 %v2255_v0  ;;  %1946 = vmatprep.subr.bf16.mxu1 %v2255_v0  ;;  %v110_v45 = vsel %vm109_vm5, %v108_v41, %v107_v42  ;;  %v272_v23 = vsel %vm97_vm1, %v271_v17, %v255_v18  ;;  %v277_v29 = vrot.slane %v259_v24, 4  ;;  %v279_v32 = vrot.slane %v260_v28, 3  ;;  %v262_v34 = vld [vmem:[#allocation3 + $0x39] sm:$0x1]  ;;  %v430_v17 = vld [vmem:[#allocation3 + $0x3a] sm:$0x1] }
  0x45   :  { %v113_v47 = vsel %vm112_vm6, %v111_v44, %v110_v45  ;;  %v274_v27 = vsel %vm100_vm2, %v273_v21, %v272_v23  ;;  %v281_v35 = vrot.slane %v261_v31, 2  ;;  %v283_v37 = vrot.slane %v262_v34, 1 }
  0x46   :  { %v116_v48 = vsel %vm115_vm7, %v114_v46, %v113_v47  ;;  %v451_v21 = vrot.slane %v430_v17, 1 }
  0x47   :  { %1924 = vmatpush3.bf16.msra.mxu0 %v2356_v13  ;;  %1948 = vmatpush3.bf16.msra.mxu1 %v2356_v13 }
  0x48   :  { %1925 = vmatprep.subr.bf16.mxu0 %v2255_v0  ;;  %1949 = vmatprep.subr.bf16.mxu1 %v2255_v0 }
  0x4b   :  { %1927 = vmatpush3.bf16.msra.mxu0 %v2362_v16  ;;  %1951 = vmatpush3.bf16.msra.mxu1 %v2362_v16 }
  0x4c   :  { %1928 = vmatprep.subr.bf16.mxu0 %v2255_v0  ;;  %1952 = vmatprep.subr.bf16.mxu1 %v2255_v0 }
  0x4f   :  { %1930 = vmatpush3.bf16.msra.mxu0 %v2368_v19  ;;  %1954 = vmatpush3.bf16.msra.mxu1 %v2368_v19 }
  0x50   :  { %1931 = vmatprep.subr.bf16.mxu0 %v2255_v0  ;;  %1955 = vmatprep.subr.bf16.mxu1 %v2255_v0 }
  0x53   :  { %1933 = vmatpush3.bf16.msra.mxu0 %v2374_v22  ;;  %1957 = vmatpush3.bf16.msra.mxu1 %v2374_v22 }
  0x54   :  { %1934 = vmatprep.subr.bf16.mxu0 %v2255_v0  ;;  %1958 = vmatprep.subr.bf16.mxu1 %v2255_v0 }
  0x57   :  { %1936 = vmatpush3.bf16.msra.mxu0 %v2380_v25  ;;  %1960 = vmatpush3.bf16.msra.mxu1 %v2380_v25 }
  0x58   :  { %1961 = vmatprep.subr.bf16.mxu0 %v2255_v0  ;;  %1985 = vmatprep.subr.bf16.mxu1 %v2255_v0 }
  0x5a   :  { %1666 = vmatmul.mubr.f32.vlgmr.msra.gmra.mrb[0].mxu0 %v61_v26  ;;  %v275_v26 = vrot.slane %v258_v20, 5 }
  0x5b   :  { %1963 = vmatpush3.bf16.msra.mxu0 %v2341_v5  ;;  %1735 = vmatprep.mubr.msk.f32.mxu0 %vm2256_vm0, %v2257_v1 }
  0x5c   :  { %1964 = vmatprep.subr.bf16.mxu0 %v2255_v0  ;;  %v276_v30 = vsel %vm103_vm3, %v275_v26, %v274_v27 }
  0x5d   :  { %v278_v33 = vsel %vm106_vm4, %v277_v29, %v276_v30 }
  0x5e   :  { %v280_v36 = vsel %vm109_vm5, %v279_v32, %v278_v33 }
  0x5f   :  { %1966 = vmatpush3.bf16.msra.mxu0 %v2344_v7  ;;  %v282_v38 = vsel %vm112_vm6, %v281_v35, %v280_v36 }
  0x60   :  { %1967 = vmatprep.subr.bf16.mxu0 %v2255_v0  ;;  %v284_v39 = vsel %vm115_vm7, %v283_v37, %v282_v38 }
  0x63   :  { %1969 = vmatpush3.bf16.msra.mxu0 %v2350_v10 }
  0x64   :  { %1970 = vmatprep.subr.bf16.mxu0 %v2255_v0 }
  0x67   :  { %1972 = vmatpush3.bf16.msra.mxu0 %v2356_v13 }
  0x68   :  { %1973 = vmatprep.subr.bf16.mxu0 %v2255_v0 }
  0x6b   :  { %1975 = vmatpush3.bf16.msra.mxu0 %v2362_v16 }
  0x6c   :  { %1976 = vmatprep.subr.bf16.mxu0 %v2255_v0 }
  0x6f   :  { %1978 = vmatpush3.bf16.msra.mxu0 %v2368_v19 }
  0x70   :  { %1979 = vmatprep.subr.bf16.mxu0 %v2255_v0 }
  0x73   :  { %1981 = vmatpush3.bf16.msra.mxu0 %v2374_v22 }
  0x74   :  { %1982 = vmatprep.subr.bf16.mxu0 %v2255_v0 }
  0x77   :  { %1984 = vmatpush3.bf16.msra.mxu0 %v2380_v25 }
  0x78   :  { %2009 = vmatprep.subr.bf16.mxu0 %v2255_v0 }
 0x12d   :  { %v184_v49 = vpop.f32.mrb[0].mxu0 }
 0x12e   :  { %v185_v50 = vadd.f32 %v184_v49, %v116_v48  ;;  %v1667_v51 = vpop.f32.mrb[1].mxu0 }
 0x130   :  { %2116 = vtanh.f32 %v185_v50 }
 0x13a   :  { %v2117_v58 = vpop.eup %2116 }
 0x13b   :  { %v190_v59 = vcombine.high %v2117_v58, %v2117_v58  ;;  %v197_v60 = vrot.slane %v2117_v58, %v2414_v57  ;;  %1701 = vmatmul.mubr.f32.vlgmr.msra.gmra.mrb[0].mxu1 %v2117_v58  ;;  %v424_v58 = vld [vmem:[#allocation3 + $0xa] sm:$0x1] }
 0x13c   :  { %1987 = vmatpush3.bf16.msra.mxu1 %v2341_v5  ;;  %1770 = vmatprep.mubr.msk.f32.mxu1 %vm2256_vm0, %v2257_v1 }
 0x13d   :  { %v204_v61 = vrot.slane %v190_v59, %v2414_v57  ;;  %v205_v62 = vcombine.high %v197_v60, %v197_v60  ;;  %v213_v63 = vrot.slane %v197_v60, %v2414_v57  ;;  %1465 = vst.sshfl [vmem:[#allocation9] sm:$0x1 pattern:$0x73625140] %v197_v60  ;;  %1988 = vmatprep.subr.bf16.mxu1 %v2255_v0  ;;  %v425_v59 = vld [vmem:[#allocation3 + $0x12] sm:$0x1] }
 0x13e   :  { %v439_v60 = vrot.slane %v424_v58, 7 }
 0x13f   :  { %v206_v2 = vcombine.high %v204_v61, %v204_v61  ;;  %v220_v3 = vrot.slane %v204_v61, %v2414_v57  ;;  %v227_v4 = vrot.slane %v205_v62, %v2414_v57  ;;  %v235_v6 = vcombine.high %v213_v63, %v213_v63  ;;  %1466 = vst.sshfl [vmem:[#allocation9 + $0x8] sm:$0x1 pattern:$0x73625140] %v205_v62  ;;  %v426_v62 = vld [vmem:[#allocation3 + $0x1a] sm:$0x1] }
 0x140   :  { %1467 = vst.sshfl [vmem:[#allocation9 + $0x20] sm:$0x1 pattern:$0x73625140] %v204_v61  ;;  %1990 = vmatpush3.bf16.msra.mxu1 %v2344_v7  ;;  %v423_v61 = vld [vmem:[#allocation3 + $0x2] sm:$0x1] }
 0x141   :  { %v234_v8 = vrot.slane %v206_v2, %v2414_v57  ;;  %v236_v9 = vcombine.high %v220_v3, %v220_v3  ;;  %v237_v11 = vcombine.high %v227_v4, %v227_v4  ;;  %249 = vst [vmem:[#allocation9 + $0x10] sm:$0x1] %v235_v6  ;;  %1468 = vst.sshfl [vmem:[#allocation9 + $0x28] sm:$0x1 pattern:$0x73625140] %v206_v2  ;;  %1991 = vmatprep.subr.bf16.mxu1 %v2255_v0 }
 0x142   :  { %v441_v63 = vrot.slane %v425_v59, 6  ;;  %v440_v2 = vsel %vm97_vm1, %v439_v60, %v423_v61  ;;  %v427_v3 = vld [vmem:[#allocation3 + $0x22] sm:$0x1]  ;;  %v443_v4 = vrot.slane %v426_v62, 5  ;;  %v598_v60 = vld [vmem:[#allocation3 + $0x3b] sm:$0x1] }
 0x143   :  { %v238_v12 = vcombine.high %v234_v8, %v234_v8  ;;  %250 = vst [vmem:[#allocation9 + $0x18] sm:$0x1] %v237_v11  ;;  %253 = vst [vmem:[#allocation9 + $0x30] sm:$0x1] %v236_v9  ;;  %v428_v8 = vld [vmem:[#allocation3 + $0x2a] sm:$0x1] }
 0x144   :  { %1993 = vmatpush3.bf16.msra.mxu1 %v2350_v10  ;;  %v442_v6 = vsel %vm100_vm2, %v441_v63, %v440_v2  ;;  %v445_v9 = vrot.slane %v427_v3, 4  ;;  %v447_v14 = vrot.slane %v428_v8, 3  ;;  %v619_v63 = vrot.slane %v598_v60, 1 }
 0x145   :  { %254 = vst [vmem:[#allocation9 + $0x38] sm:$0x1] %v238_v12  ;;  %1994 = vmatprep.subr.bf16.mxu1 %v2255_v0  ;;  %v444_v11 = vsel %vm103_vm3, %v443_v4, %v442_v6  ;;  %v429_v12 = vld [vmem:[#allocation3 + $0x32] sm:$0x1] }
 0x146   :  { %v446_v15 = vsel %vm106_vm4, %v445_v9, %v444_v11  ;;  %v449_v18 = vrot.slane %v429_v12, 2 }
 0x147   :  { %v448_v20 = vsel %vm109_vm5, %v447_v14, %v446_v15 }
 0x148   :  { %1996 = vmatpush3.bf16.msra.mxu1 %v2356_v13  ;;  %v450_v23 = vsel %vm112_vm6, %v449_v18, %v448_v20 }
 0x149   :  { %1997 = vmatprep.subr.bf16.mxu1 %v2255_v0  ;;  %v452_v24 = vsel %vm115_vm7, %v451_v21, %v450_v23 }
 0x14c   :  { %1999 = vmatpush3.bf16.msra.mxu1 %v2362_v16 }
 0x14d   :  { %2000 = vmatprep.subr.bf16.mxu1 %v2255_v0 }
 0x150   :  { %2002 = vmatpush3.bf16.msra.mxu1 %v2368_v19 }
 0x151   :  { %2003 = vmatprep.subr.bf16.mxu1 %v2255_v0 }
 0x154   :  { %2005 = vmatpush3.bf16.msra.mxu1 %v2374_v22 }
 0x155   :  { %2006 = vmatprep.subr.bf16.mxu1 %v2255_v0 }
 0x158   :  { %2008 = vmatpush3.bf16.msra.mxu1 %v2380_v25 }
 0x159   :  { %2033 = vmatprep.subr.bf16.mxu1 %v2255_v0 }
 0x20e   :  { %v352_v40 = vpop.f32.mrb[0].mxu1 }
 0x20f   :  { %v353_v41 = vadd.f32 %v352_v40, %v284_v39  ;;  %v1702_v42 = vpop.f32.mrb[1].mxu1 }
 0x211   :  { %2118 = vtanh.f32 %v353_v41 }
 0x21b   :  { %v2119_v43 = vpop.eup %2118 }
 0x21c   :  { %v358_v44 = vcombine.high %v2119_v43, %v2119_v43  ;;  %v365_v45 = vrot.slane %v2119_v43, %v2414_v57  ;;  %1736 = vmatmul.mubr.f32.vlgmr.msra.gmra.mrb[2].mxu0 %v2119_v43  ;;  %v592_v43 = vld [vmem:[#allocation3 + $0xb] sm:$0x1] }
 0x21d   :  { %2011 = vmatpush3.bf16.msra.mxu0 %v2341_v5  ;;  %1805 = vmatprep.mubr.msk.f32.mxu0 %vm2256_vm0, %v2257_v1 }
 0x21e   :  { %v372_v46 = vrot.slane %v358_v44, %v2414_v57  ;;  %v373_v47 = vcombine.high %v365_v45, %v365_v45  ;;  %v381_v48 = vrot.slane %v365_v45, %v2414_v57  ;;  %1469 = vst.sshfl [vmem:[#allocation9 + $0x1] sm:$0x1 pattern:$0x73625140] %v365_v45  ;;  %2012 = vmatprep.subr.bf16.mxu0 %v2255_v0  ;;  %v593_v44 = vld [vmem:[#allocation3 + $0x13] sm:$0x1] }
 0x21f   :  { %v607_v45 = vrot.slane %v592_v43, 7 }
 0x220   :  { %v374_v49 = vcombine.high %v372_v46, %v372_v46  ;;  %v388_v50 = vrot.slane %v372_v46, %v2414_v57  ;;  %v395_v51 = vrot.slane %v373_v47, %v2414_v57  ;;  %v403_v52 = vcombine.high %v381_v48, %v381_v48  ;;  %1470 = vst.sshfl [vmem:[#allocation9 + $0x9] sm:$0x1 pattern:$0x73625140] %v373_v47  ;;  %v594_v47 = vld [vmem:[#allocation3 + $0x1b] sm:$0x1] }
 0x221   :  { %1471 = vst.sshfl [vmem:[#allocation9 + $0x21] sm:$0x1 pattern:$0x73625140] %v372_v46  ;;  %2014 = vmatpush3.bf16.msra.mxu0 %v2344_v7  ;;  %v591_v46 = vld [vmem:[#allocation3 + $0x3] sm:$0x1] }
 0x222   :  { %v402_v53 = vrot.slane %v374_v49, %v2414_v57  ;;  %v404_v54 = vcombine.high %v388_v50, %v388_v50  ;;  %v405_v55 = vcombine.high %v395_v51, %v395_v51  ;;  %417 = vst [vmem:[#allocation9 + $0x11] sm:$0x1] %v403_v52  ;;  %1472 = vst.sshfl [vmem:[#allocation9 + $0x29] sm:$0x1 pattern:$0x73625140] %v374_v49  ;;  %2015 = vmatprep.subr.bf16.mxu0 %v2255_v0 }
 0x223   :  { %v609_v48 = vrot.slane %v593_v44, 6  ;;  %v608_v49 = vsel %vm97_vm1, %v607_v45, %v591_v46  ;;  %v595_v50 = vld [vmem:[#allocation3 + $0x23] sm:$0x1]  ;;  %v611_v51 = vrot.slane %v594_v47, 5  ;;  %v766_v45 = vld [vmem:[#allocation3 + $0x3c] sm:$0x1] }
 0x224   :  { %v406_v56 = vcombine.high %v402_v53, %v402_v53  ;;  %418 = vst [vmem:[#allocation9 + $0x19] sm:$0x1] %v405_v55  ;;  %421 = vst [vmem:[#allocation9 + $0x31] sm:$0x1] %v404_v54  ;;  %v596_v53 = vld [vmem:[#allocation3 + $0x2b] sm:$0x1] }
 0x225   :  { %2017 = vmatpush3.bf16.msra.mxu0 %v2350_v10  ;;  %v610_v52 = vsel %vm100_vm2, %v609_v48, %v608_v49  ;;  %v613_v54 = vrot.slane %v595_v50, 4  ;;  %v615_v58 = vrot.slane %v596_v53, 3  ;;  %v787_v48 = vrot.slane %v766_v45, 1  ;;  %v1097_v45 = vld [vmem:[#allocation3 + $0x16] sm:$0x1] }
 0x226   :  { %422 = vst [vmem:[#allocation9 + $0x39] sm:$0x1] %v406_v56  ;;  %2018 = vmatprep.subr.bf16.mxu0 %v2255_v0  ;;  %v612_v55 = vsel %vm103_vm3, %v611_v51, %v610_v52  ;;  %v597_v56 = vld [vmem:[#allocation3 + $0x33] sm:$0x1] }
 0x227   :  { %v614_v59 = vsel %vm106_vm4, %v613_v54, %v612_v55  ;;  %v617_v61 = vrot.slane %v597_v56, 2 }
 0x228   :  { %v616_v62 = vsel %vm109_vm5, %v615_v58, %v614_v59 }
 0x229   :  { %2020 = vmatpush3.bf16.msra.mxu0 %v2356_v13  ;;  %v618_v2 = vsel %vm112_vm6, %v617_v61, %v616_v62 }
 0x22a   :  { %2021 = vmatprep.subr.bf16.mxu0 %v2255_v0  ;;  %v620_v3 = vsel %vm115_vm7, %v619_v63, %v618_v2 }
 0x22d   :  { %2023 = vmatpush3.bf16.msra.mxu0 %v2362_v16 }
 0x22e   :  { %2024 = vmatprep.subr.bf16.mxu0 %v2255_v0 }
 0x231   :  { %2026 = vmatpush3.bf16.msra.mxu0 %v2368_v19 }
 0x232   :  { %2027 = vmatprep.subr.bf16.mxu0 %v2255_v0 }
 0x235   :  { %2029 = vmatpush3.bf16.msra.mxu0 %v2374_v22 }
 0x236   :  { %2030 = vmatprep.subr.bf16.mxu0 %v2255_v0 }
 0x239   :  { %2032 = vmatpush3.bf16.msra.mxu0 %v2380_v25 }
 0x23a   :  { %2057 = vmatprep.subr.bf16.mxu0 %v2255_v0 }
 0x2ef   :  { %v520_v26 = vpop.f32.mrb[2].mxu0 }
 0x2f0   :  { %v521_v27 = vadd.f32 %v520_v26, %v452_v24  ;;  %v1737_v28 = vpop.f32.mrb[3].mxu0 }
 0x2f2   :  { %2120 = vtanh.f32 %v521_v27 }
 0x2fc   :  { %v2121_v29 = vpop.eup %2120 }
 0x2fd   :  { %v526_v30 = vcombine.high %v2121_v29, %v2121_v29  ;;  %v533_v31 = vrot.slane %v2121_v29, %v2414_v57  ;;  %1771 = vmatmul.mubr.f32.vlgmr.msra.gmra.mrb[2].mxu1 %v2121_v29  ;;  %v760_v29 = vld [vmem:[#allocation3 + $0xc] sm:$0x1] }
 0x2fe   :  { %2035 = vmatpush3.bf16.msra.mxu1 %v2341_v5  ;;  %1840 = vmatprep.mubr.msk.f32.mxu1 %vm2256_vm0, %v2257_v1 }
 0x2ff   :  { %v540_v32 = vrot.slane %v526_v30, %v2414_v57  ;;  %v541_v33 = vcombine.high %v533_v31, %v533_v31  ;;  %v549_v34 = vrot.slane %v533_v31, %v2414_v57  ;;  %1473 = vst.sshfl [vmem:[#allocation9 + $0x2] sm:$0x1 pattern:$0x73625140] %v533_v31  ;;  %2036 = vmatprep.subr.bf16.mxu1 %v2255_v0  ;;  %v761_v30 = vld [vmem:[#allocation3 + $0x14] sm:$0x1] }
 0x300   :  { %v775_v31 = vrot.slane %v760_v29, 7 }
 0x301   :  { %v542_v35 = vcombine.high %v540_v32, %v540_v32  ;;  %v556_v36 = vrot.slane %v540_v32, %v2414_v57  ;;  %v563_v37 = vrot.slane %v541_v33, %v2414_v57  ;;  %v571_v38 = vcombine.high %v549_v34, %v549_v34  ;;  %1474 = vst.sshfl [vmem:[#allocation9 + $0xa] sm:$0x1 pattern:$0x73625140] %v541_v33  ;;  %v762_v33 = vld [vmem:[#allocation3 + $0x1c] sm:$0x1] }
 0x302   :  { %1475 = vst.sshfl [vmem:[#allocation9 + $0x22] sm:$0x1 pattern:$0x73625140] %v540_v32  ;;  %2038 = vmatpush3.bf16.msra.mxu1 %v2344_v7  ;;  %v759_v32 = vld [vmem:[#allocation3 + $0x4] sm:$0x1] }
 0x303   :  { %v570_v39 = vrot.slane %v542_v35, %v2414_v57  ;;  %v572_v40 = vcombine.high %v556_v36, %v556_v36  ;;  %v573_v41 = vcombine.high %v563_v37, %v563_v37  ;;  %585 = vst [vmem:[#allocation9 + $0x12] sm:$0x1] %v571_v38  ;;  %1476 = vst.sshfl [vmem:[#allocation9 + $0x2a] sm:$0x1 pattern:$0x73625140] %v542_v35  ;;  %2039 = vmatprep.subr.bf16.mxu1 %v2255_v0 }
 0x304   :  { %v777_v34 = vrot.slane %v761_v30, 6  ;;  %v776_v35 = vsel %vm97_vm1, %v775_v31, %v759_v32  ;;  %v763_v36 = vld [vmem:[#allocation3 + $0x24] sm:$0x1]  ;;  %v779_v37 = vrot.slane %v762_v33, 5 }
 0x305   :  { %v574_v42 = vcombine.high %v570_v39, %v570_v39  ;;  %586 = vst [vmem:[#allocation9 + $0x1a] sm:$0x1] %v573_v41  ;;  %589 = vst [vmem:[#allocation9 + $0x32] sm:$0x1] %v572_v40  ;;  %v764_v39 = vld [vmem:[#allocation3 + $0x2c] sm:$0x1] }
 0x306   :  { %2041 = vmatpush3.bf16.msra.mxu1 %v2350_v10  ;;  %v778_v38 = vsel %vm100_vm2, %v777_v34, %v776_v35  ;;  %v781_v40 = vrot.slane %v763_v36, 4  ;;  %v783_v43 = vrot.slane %v764_v39, 3 }
 0x307   :  { %590 = vst [vmem:[#allocation9 + $0x3a] sm:$0x1] %v574_v42  ;;  %2042 = vmatprep.subr.bf16.mxu1 %v2255_v0  ;;  %v780_v41 = vsel %vm103_vm3, %v779_v37, %v778_v38  ;;  %v765_v42 = vld [vmem:[#allocation3 + $0x34] sm:$0x1] }
 0x308   :  { %v782_v44 = vsel %vm106_vm4, %v781_v40, %v780_v41  ;;  %v785_v46 = vrot.slane %v765_v42, 2 }
 0x309   :  { %v784_v47 = vsel %vm109_vm5, %v783_v43, %v782_v44  ;;  %v1096_v44 = vld [vmem:[#allocation3 + $0xe] sm:$0x1] }
 0x30a   :  { %2044 = vmatpush3.bf16.msra.mxu1 %v2356_v13  ;;  %v786_v49 = vsel %vm112_vm6, %v785_v46, %v784_v47  ;;  %v1111_v46 = vrot.slane %v1096_v44, 7  ;;  %v1095_v47 = vld [vmem:[#allocation3 + $0x6] sm:$0x1] }
 0x30b   :  { %2045 = vmatprep.subr.bf16.mxu1 %v2255_v0  ;;  %v788_v50 = vsel %vm115_vm7, %v787_v48, %v786_v49  ;;  %v1098_v48 = vld [vmem:[#allocation3 + $0x1e] sm:$0x1]  ;;  %v1113_v49 = vrot.slane %v1097_v45, 6 }
 0x30e   :  { %2047 = vmatpush3.bf16.msra.mxu1 %v2362_v16 }
 0x30f   :  { %2048 = vmatprep.subr.bf16.mxu1 %v2255_v0 }
 0x312   :  { %2050 = vmatpush3.bf16.msra.mxu1 %v2368_v19 }
 0x313   :  { %2051 = vmatprep.subr.bf16.mxu1 %v2255_v0 }
 0x316   :  { %2053 = vmatpush3.bf16.msra.mxu1 %v2374_v22 }
 0x317   :  { %2054 = vmatprep.subr.bf16.mxu1 %v2255_v0 }
 0x31a   :  { %2056 = vmatpush3.bf16.msra.mxu1 %v2380_v25 }
 0x31b   :  { %2081 = vmatprep.subr.bf16.mxu1 %v2255_v0 }
 0x3d0   :  { %v688_v4 = vpop.f32.mrb[2].mxu1 }
 0x3d1   :  { %v689_v6 = vadd.f32 %v688_v4, %v620_v3  ;;  %v1772_v8 = vpop.f32.mrb[3].mxu1 }
 0x3d2   :  { %v930_v8 = vld [vmem:[#allocation3 + $0x1d] sm:$0x1] }
 0x3d3   :  { %2122 = vtanh.f32 %v689_v6 }
 0x3dd   :  { %v2123_v9 = vpop.eup %2122 }
 0x3de   :  { %v694_v11 = vcombine.high %v2123_v9, %v2123_v9  ;;  %v701_v12 = vrot.slane %v2123_v9, %v2414_v57  ;;  %1806 = vmatmul.mubr.f32.vlgmr.msra.gmra.mrb[4].mxu0 %v2123_v9 }
 0x3df   :  { %2059 = vmatpush3.bf16.msra.mxu0 %v2341_v5  ;;  %1875 = vmatprep.mubr.msk.f32.mxu0 %vm2256_vm0, %v2257_v1 }
 0x3e0   :  { %v708_v14 = vrot.slane %v694_v11, %v2414_v57  ;;  %v709_v15 = vcombine.high %v701_v12, %v701_v12  ;;  %v717_v17 = vrot.slane %v701_v12, %v2414_v57  ;;  %1477 = vst.sshfl [vmem:[#allocation9 + $0x3] sm:$0x1 pattern:$0x73625140] %v701_v12  ;;  %2060 = vmatprep.subr.bf16.mxu0 %v2255_v0  ;;  %v931_v11 = vld [vmem:[#allocation3 + $0x25] sm:$0x1] }
 0x3e1   :  { %v947_v12 = vrot.slane %v930_v8, 5 }
 0x3e2   :  { %v710_v18 = vcombine.high %v708_v14, %v708_v14  ;;  %v724_v20 = vrot.slane %v708_v14, %v2414_v57  ;;  %v731_v21 = vrot.slane %v709_v15, %v2414_v57  ;;  %v739_v23 = vcombine.high %v717_v17, %v717_v17  ;;  %1478 = vst.sshfl [vmem:[#allocation9 + $0xb] sm:$0x1 pattern:$0x73625140] %v709_v15  ;;  %v933_v17 = vld [vmem:[#allocation3 + $0x35] sm:$0x1] }
 0x3e3   :  { %1479 = vst.sshfl [vmem:[#allocation9 + $0x23] sm:$0x1 pattern:$0x73625140] %v708_v14  ;;  %2062 = vmatpush3.bf16.msra.mxu0 %v2344_v7  ;;  %v932_v14 = vld [vmem:[#allocation3 + $0x2d] sm:$0x1] }
 0x3e4   :  { %v738_v24 = vrot.slane %v710_v18, %v2414_v57  ;;  %v740_v26 = vcombine.high %v724_v20, %v724_v20  ;;  %v741_v27 = vcombine.high %v731_v21, %v731_v21  ;;  %753 = vst [vmem:[#allocation9 + $0x13] sm:$0x1] %v739_v23  ;;  %1480 = vst.sshfl [vmem:[#allocation9 + $0x2b] sm:$0x1 pattern:$0x73625140] %v710_v18  ;;  %2063 = vmatprep.subr.bf16.mxu0 %v2255_v0 }
 0x3e5   :  { %v949_v15 = vrot.slane %v931_v11, 4  ;;  %v934_v18 = vld [vmem:[#allocation3 + $0x3d] sm:$0x1]  ;;  %v953_v20 = vrot.slane %v933_v17, 2 }
 0x3e6   :  { %v742_v28 = vcombine.high %v738_v24, %v738_v24  ;;  %754 = vst [vmem:[#allocation9 + $0x1b] sm:$0x1] %v741_v27  ;;  %757 = vst [vmem:[#allocation9 + $0x33] sm:$0x1] %v740_v26  ;;  %v955_v23 = vrot.slane %v934_v18, 1 }
 0x3e7   :  { %2065 = vmatpush3.bf16.msra.mxu0 %v2350_v10  ;;  %v1265_v18 = vld [vmem:[#allocation3 + $0x17] sm:$0x1] }
 0x3e8   :  { %758 = vst [vmem:[#allocation9 + $0x3b] sm:$0x1] %v742_v28  ;;  %2066 = vmatprep.subr.bf16.mxu0 %v2255_v0 }
 0x3eb   :  { %2068 = vmatpush3.bf16.msra.mxu0 %v2356_v13 }
 0x3ec   :  { %2069 = vmatprep.subr.bf16.mxu0 %v2255_v0 }
 0x3ef   :  { %2071 = vmatpush3.bf16.msra.mxu0 %v2362_v16 }
 0x3f0   :  { %2072 = vmatprep.subr.bf16.mxu0 %v2255_v0 }
 0x3f3   :  { %2074 = vmatpush3.bf16.msra.mxu0 %v2368_v19 }
 0x3f4   :  { %2075 = vmatprep.subr.bf16.mxu0 %v2255_v0 }
 0x3f7   :  { %2077 = vmatpush3.bf16.msra.mxu0 %v2374_v22 }
 0x3f8   :  { %2078 = vmatprep.subr.bf16.mxu0 %v2255_v0 }
 0x3fb   :  { %2080 = vmatpush3.bf16.msra.mxu0 %v2380_v25 }
 0x4b1   :  { %v856_v51 = vpop.f32.mrb[4].mxu0 }
 0x4b2   :  { %v857_v52 = vadd.f32 %v856_v51, %v788_v50  ;;  %v1807_v53 = vpop.f32.mrb[5].mxu0  ;;  %v1112_v50 = vsel %vm97_vm1, %v1111_v46, %v1095_v47  ;;  %v1099_v51 = vld [vmem:[#allocation3 + $0x26] sm:$0x1] }
 0x4b3   :  { %v1114_v53 = vsel %vm100_vm2, %v1113_v49, %v1112_v50 }
 0x4b4   :  { %2124 = vtanh.f32 %v857_v52  ;;  %v1115_v52 = vrot.slane %v1098_v48, 5 }
 0x4be   :  { %v2125_v54 = vpop.eup %2124 }
 0x4bf   :  { %v862_v55 = vcombine.high %v2125_v54, %v2125_v54  ;;  %v869_v56 = vrot.slane %v2125_v54, %v2414_v57  ;;  %1841 = vmatmul.mubr.f32.vlgmr.msra.gmra.mrb[4].mxu1 %v2125_v54  ;;  %v1100_v54 = vld [vmem:[#allocation3 + $0x2e] sm:$0x1] }
 0x4c0   :  { %2083 = vmatpush3.bf16.msra.mxu1 %v2341_v5  ;;  %1910 = vmatprep.mubr.msk.f32.mxu1 %vm2256_vm0, %v2257_v1 }
 0x4c1   :  { %v876_v58 = vrot.slane %v862_v55, %v2414_v57  ;;  %v877_v59 = vcombine.high %v869_v56, %v869_v56  ;;  %v885_v60 = vrot.slane %v869_v56, %v2414_v57  ;;  %1481 = vst.sshfl [vmem:[#allocation9 + $0x4] sm:$0x1 pattern:$0x73625140] %v869_v56  ;;  %2084 = vmatprep.subr.bf16.mxu1 %v2255_v0  ;;  %v1117_v55 = vrot.slane %v1099_v51, 4 }
 0x4c2   :  { %v1116_v56 = vsel %vm103_vm3, %v1115_v52, %v1114_v53 }
 0x4c3   :  { %v878_v61 = vcombine.high %v876_v58, %v876_v58  ;;  %v892_v62 = vrot.slane %v876_v58, %v2414_v57  ;;  %v899_v63 = vrot.slane %v877_v59, %v2414_v57  ;;  %v907_v2 = vcombine.high %v885_v60, %v885_v60  ;;  %1482 = vst.sshfl [vmem:[#allocation9 + $0xc] sm:$0x1 pattern:$0x73625140] %v877_v59 }
 0x4c4   :  { %1483 = vst.sshfl [vmem:[#allocation9 + $0x24] sm:$0x1 pattern:$0x73625140] %v876_v58  ;;  %2086 = vmatpush3.bf16.msra.mxu1 %v2344_v7  ;;  %v928_v7 = vld [vmem:[#allocation3 + $0xd] sm:$0x1]  ;;  %v1118_v60 = vsel %vm106_vm4, %v1117_v55, %v1116_v56 }
 0x4c5   :  { %v906_v1 = vrot.slane %v878_v61, %v2414_v57  ;;  %v908_v5 = vcombine.high %v892_v62, %v892_v62  ;;  %v909_v3 = vcombine.high %v899_v63, %v899_v63  ;;  %921 = vst [vmem:[#allocation9 + $0x14] sm:$0x1] %v907_v2  ;;  %1484 = vst.sshfl [vmem:[#allocation9 + $0x2c] sm:$0x1 pattern:$0x73625140] %v878_v61  ;;  %2087 = vmatprep.subr.bf16.mxu1 %v2255_v0 }
 0x4c6   :  { %v943_v6 = vrot.slane %v928_v7, 7  ;;  %v1101_v58 = vld [vmem:[#allocation3 + $0x36] sm:$0x1]  ;;  %v1119_v59 = vrot.slane %v1100_v54, 3  ;;  %v1102_v61 = vld [vmem:[#allocation3 + $0x3e] sm:$0x1] }
 0x4c7   :  { %v910_v4 = vcombine.high %v906_v1, %v906_v1  ;;  %922 = vst [vmem:[#allocation9 + $0x1c] sm:$0x1] %v909_v3  ;;  %925 = vst [vmem:[#allocation9 + $0x34] sm:$0x1] %v908_v5  ;;  %v1121_v62 = vrot.slane %v1101_v58, 2  ;;  %v1123_v2 = vrot.slane %v1102_v61, 1 }
 0x4c8   :  { %2089 = vmatpush3.bf16.msra.mxu1 %v2350_v10  ;;  %v929_v10 = vld [vmem:[#allocation3 + $0x15] sm:$0x1]  ;;  %v1120_v63 = vsel %vm109_vm5, %v1119_v59, %v1118_v60 }
 0x4c9   :  { %926 = vst [vmem:[#allocation9 + $0x3c] sm:$0x1] %v910_v4  ;;  %2090 = vmatprep.subr.bf16.mxu1 %v2255_v0  ;;  %v945_v9 = vrot.slane %v929_v10, 6  ;;  %v1122_v1 = vsel %vm112_vm6, %v1121_v62, %v1120_v63 }
 0x4ca   :  { %v1124_v5 = vsel %vm115_vm7, %v1123_v2, %v1122_v1 }
 0x4cc   :  { %2092 = vmatpush3.bf16.msra.mxu1 %v2356_v13  ;;  %v927_v13 = vld [vmem:[#allocation3 + $0x5] sm:$0x1] }
 0x4cd   :  { %2093 = vmatprep.subr.bf16.mxu1 %v2255_v0 }
 0x4d0   :  { %2095 = vmatpush3.bf16.msra.mxu1 %v2362_v16  ;;  %v944_v16 = vsel %vm97_vm1, %v943_v6, %v927_v13 }
 0x4d1   :  { %2096 = vmatprep.subr.bf16.mxu1 %v2255_v0 }
 0x4d4   :  { %2098 = vmatpush3.bf16.msra.mxu1 %v2368_v19  ;;  %v946_v19 = vsel %vm100_vm2, %v945_v9, %v944_v16 }
 0x4d5   :  { %2099 = vmatprep.subr.bf16.mxu1 %v2255_v0 }
 0x4d8   :  { %2101 = vmatpush3.bf16.msra.mxu1 %v2374_v22  ;;  %v948_v22 = vsel %vm103_vm3, %v947_v12, %v946_v19 }
 0x4d9   :  { %2102 = vmatprep.subr.bf16.mxu1 %v2255_v0  ;;  %v951_v0 = vrot.slane %v932_v14, 3 }
 0x4dc   :  { %2104 = vmatpush3.bf16.msra.mxu1 %v2380_v25  ;;  %v950_v25 = vsel %vm106_vm4, %v949_v15, %v948_v22 }
 0x4dd   :  { %v952_v21 = vsel %vm109_vm5, %v951_v0, %v950_v25  ;;  %v1264_v25 = vld [vmem:[#allocation3 + $0xf] sm:$0x1] }
 0x4de   :  { %v954_v24 = vsel %vm112_vm6, %v953_v20, %v952_v21  ;;  %v1279_v20 = vrot.slane %v1264_v25, 7  ;;  %v1263_v21 = vld [vmem:[#allocation3 + $0x7] sm:$0x1] }
 0x4df   :  { %v956_v26 = vsel %vm115_vm7, %v955_v23, %v954_v24  ;;  %v1266_v23 = vld [vmem:[#allocation3 + $0x1f] sm:$0x1]  ;;  %v1281_v24 = vrot.slane %v1265_v18, 6 }
 0x592   :  { %v1024_v27 = vpop.f32.mrb[4].mxu1 }
 0x593   :  { %v1025_v28 = vadd.f32 %v1024_v27, %v956_v26  ;;  %v1842_v29 = vpop.f32.mrb[5].mxu1  ;;  %v1280_v26 = vsel %vm97_vm1, %v1279_v20, %v1263_v21  ;;  %v1267_v27 = vld [vmem:[#allocation3 + $0x27] sm:$0x1] }
 0x594   :  { %v1282_v29 = vsel %vm100_vm2, %v1281_v24, %v1280_v26 }
 0x595   :  { %2126 = vtanh.f32 %v1025_v28  ;;  %v1283_v28 = vrot.slane %v1266_v23, 5 }
 0x59f   :  { %v2127_v30 = vpop.eup %2126 }
 0x5a0   :  { %v1030_v31 = vcombine.high %v2127_v30, %v2127_v30  ;;  %v1037_v32 = vrot.slane %v2127_v30, %v2414_v57  ;;  %1876 = vmatmul.mubr.f32.vlgmr.msra.gmra.mrb[6].mxu0 %v2127_v30  ;;  %v1268_v30 = vld [vmem:[#allocation3 + $0x2f] sm:$0x1] }
 0x5a2   :  { %v1044_v33 = vrot.slane %v1030_v31, %v2414_v57  ;;  %v1045_v34 = vcombine.high %v1037_v32, %v1037_v32  ;;  %v1053_v35 = vrot.slane %v1037_v32, %v2414_v57  ;;  %1485 = vst.sshfl [vmem:[#allocation9 + $0x5] sm:$0x1 pattern:$0x73625140] %v1037_v32  ;;  %v1285_v31 = vrot.slane %v1267_v27, 4 }
 0x5a3   :  { %v1284_v32 = vsel %vm103_vm3, %v1283_v28, %v1282_v29 }
 0x5a4   :  { %v1046_v36 = vcombine.high %v1044_v33, %v1044_v33  ;;  %v1060_v37 = vrot.slane %v1044_v33, %v2414_v57  ;;  %v1067_v38 = vrot.slane %v1045_v34, %v2414_v57  ;;  %v1075_v39 = vcombine.high %v1053_v35, %v1053_v35  ;;  %1486 = vst.sshfl [vmem:[#allocation9 + $0xd] sm:$0x1 pattern:$0x73625140] %v1045_v34 }
 0x5a5   :  { %1487 = vst.sshfl [vmem:[#allocation9 + $0x25] sm:$0x1 pattern:$0x73625140] %v1044_v33  ;;  %v1269_v33 = vld [vmem:[#allocation3 + $0x37] sm:$0x1]  ;;  %v1286_v35 = vsel %vm106_vm4, %v1285_v31, %v1284_v32 }
 0x5a6   :  { %v1074_v40 = vrot.slane %v1046_v36, %v2414_v57  ;;  %v1076_v41 = vcombine.high %v1060_v37, %v1060_v37  ;;  %v1077_v42 = vcombine.high %v1067_v38, %v1067_v38  ;;  %1089 = vst [vmem:[#allocation9 + $0x15] sm:$0x1] %v1075_v39  ;;  %1488 = vst.sshfl [vmem:[#allocation9 + $0x2d] sm:$0x1 pattern:$0x73625140] %v1046_v36 }
 0x5a7   :  { %v1287_v34 = vrot.slane %v1268_v30, 3  ;;  %v1270_v36 = vld [vmem:[#allocation3 + $0x3f] sm:$0x1]  ;;  %v1289_v37 = vrot.slane %v1269_v33, 2 }
 0x5a8   :  { %v1078_v43 = vcombine.high %v1074_v40, %v1074_v40  ;;  %1090 = vst [vmem:[#allocation9 + $0x1d] sm:$0x1] %v1077_v42  ;;  %1093 = vst [vmem:[#allocation9 + $0x35] sm:$0x1] %v1076_v41  ;;  %v1291_v39 = vrot.slane %v1270_v36, 1 }
 0x5a9   :  { %v1288_v38 = vsel %vm109_vm5, %v1287_v34, %v1286_v35 }
 0x5aa   :  { %1094 = vst [vmem:[#allocation9 + $0x3d] sm:$0x1] %v1078_v43  ;;  %v1290_v40 = vsel %vm112_vm6, %v1289_v37, %v1288_v38 }
 0x5ab   :  { %v1292_v41 = vsel %vm115_vm7, %v1291_v39, %v1290_v40 }
 0x673   :  { %v1192_v3 = vpop.f32.mrb[6].mxu0 }
 0x674   :  { %v1193_v4 = vadd.f32 %v1192_v3, %v1124_v5  ;;  %v1877_v7 = vpop.f32.mrb[7].mxu0 }
 0x676   :  { %2128 = vtanh.f32 %v1193_v4 }
 0x680   :  { %v2129_v10 = vpop.eup %2128 }
 0x681   :  { %v1198_v6 = vcombine.high %v2129_v10, %v2129_v10  ;;  %v1205_v13 = vrot.slane %v2129_v10, %v2414_v57  ;;  %1911 = vmatmul.mubr.f32.vlgmr.msra.gmra.mrb[6].mxu1 %v2129_v10 }
 0x683   :  { %v1212_v8 = vrot.slane %v1198_v6, %v2414_v57  ;;  %v1213_v9 = vcombine.high %v1205_v13, %v1205_v13  ;;  %v1221_v16 = vrot.slane %v1205_v13, %v2414_v57  ;;  %1489 = vst.sshfl [vmem:[#allocation9 + $0x6] sm:$0x1 pattern:$0x73625140] %v1205_v13 }
 0x685   :  { %v1214_v11 = vcombine.high %v1212_v8, %v1212_v8  ;;  %v1228_v12 = vrot.slane %v1212_v8, %v2414_v57  ;;  %v1235_v19 = vrot.slane %v1213_v9, %v2414_v57  ;;  %v1243_v14 = vcombine.high %v1221_v16, %v1221_v16  ;;  %1490 = vst.sshfl [vmem:[#allocation9 + $0xe] sm:$0x1 pattern:$0x73625140] %v1213_v9 }
 0x686   :  { %1491 = vst.sshfl [vmem:[#allocation9 + $0x26] sm:$0x1 pattern:$0x73625140] %v1212_v8 }
 0x687   :  { %v1242_v15 = vrot.slane %v1214_v11, %v2414_v57  ;;  %v1244_v22 = vcombine.high %v1228_v12, %v1228_v12  ;;  %v1245_v17 = vcombine.high %v1235_v19, %v1235_v19  ;;  %1257 = vst [vmem:[#allocation9 + $0x16] sm:$0x1] %v1243_v14  ;;  %1492 = vst.sshfl [vmem:[#allocation9 + $0x2e] sm:$0x1 pattern:$0x73625140] %v1214_v11 }
 0x689   :  { %v1246_v0 = vcombine.high %v1242_v15, %v1242_v15  ;;  %1258 = vst [vmem:[#allocation9 + $0x1e] sm:$0x1] %v1245_v17  ;;  %1261 = vst [vmem:[#allocation9 + $0x36] sm:$0x1] %v1244_v22 }
 0x68b   :  { %1262 = vst [vmem:[#allocation9 + $0x3e] sm:$0x1] %v1246_v0 }
 0x754   :  { %v1360_v42 = vpop.f32.mrb[6].mxu1 }
 0x755   :  { %v1361_v43 = vadd.f32 %v1360_v42, %v1292_v41  ;;  %v1912_v44 = vpop.f32.mrb[7].mxu1 }
 0x757   :  { %2130 = vtanh.f32 %v1361_v43 }
 0x761   :  { %v2131_v45 = vpop.eup %2130 }
 0x762   :  { %v1366_v46 = vcombine.high %v2131_v45, %v2131_v45  ;;  %v1373_v47 = vrot.slane %v2131_v45, %v2414_v57  ;;  %1432 = vst [vmem:[#allocation10] sm:$0xff] %v2131_v45 }
 0x763   :  { %2209 = shalt.err (!%p2206_p0)
}
 0x764   :  { %s2210_s29 = scalar_lea.hbm %s2632_s4, 128 }
 0x765   :  { %p2211_p1 = scmp.ne.s32.totalorder %s2632_s4, %s2210_s29  ;;  %p2214_p2 = scmp.lt.u32.totalorder %s2210_s29, %s2632_s4 }
 0x767   :  { %p2216_p3 = pnand %p2214_p2, %p2211_p1 }
 0x769   :  { %2219 = shalt.err (!%p2216_p3)
}
 0x76a   :  { %1454 = dma.vmem_to_hbm [thread:$0]  %s1452_s25, 128, %s2632_s4, [#allocation11]   ;;  %v1380_v48 = vrot.slane %v1366_v46, %v2414_v57  ;;  %v1381_v49 = vcombine.high %v1373_v47, %v1373_v47  ;;  %v1389_v50 = vrot.slane %v1373_v47, %v2414_v57  ;;  %1493 = vst.sshfl [vmem:[#allocation9 + $0x7] sm:$0x1 pattern:$0x73625140] %v1373_v47 }
 0x76b   :  { %s2260_s10 = smov [#allocation9]  }
 0x76c   :  { %v1382_v51 = vcombine.high %v1380_v48, %v1380_v48  ;;  %v1396_v52 = vrot.slane %v1380_v48, %v2414_v57  ;;  %v1403_v53 = vrot.slane %v1381_v49, %v2414_v57  ;;  %v1411_v54 = vcombine.high %v1389_v50, %v1389_v50  ;;  %1494 = vst.sshfl [vmem:[#allocation9 + $0xf] sm:$0x1 pattern:$0x73625140] %v1381_v49  ;;  %s1438_s12 = sshll.u32 %s2260_s10, 4  ;;  %s1439_s12 = int_to_ptr.vmem [resolvable:$true] %s1438_s12 }
 0x76d   :  { %1495 = vst.sshfl [vmem:[#allocation9 + $0x27] sm:$0x1 pattern:$0x73625140] %v1380_v48  ;;  %s2220_s4 = scalar_lea.vmem %s1439_s12, 1024  ;;  %p2225_p5 = scmp.lt.s32.totalorder %s1439_s12, %s1439_s12 }
 0x76e   :  { %v1410_v55 = vrot.slane %v1382_v51, %v2414_v57  ;;  %v1412_v56 = vcombine.high %v1396_v52, %v1396_v52  ;;  %v1413_v58 = vcombine.high %v1403_v53, %v1403_v53  ;;  %1425 = vst [vmem:[#allocation9 + $0x17] sm:$0x1] %v1411_v54  ;;  %1496 = vst.sshfl [vmem:[#allocation9 + $0x2f] sm:$0x1 pattern:$0x73625140] %v1382_v51  ;;  %p2221_p4 = scmp.ne.s32.totalorder %s1439_s12, %s2220_s4  ;;  %p2226_p6 = scmp.lt.s32.totalorder %s2220_s4, %s2220_s4 }
 0x770   :  { %v1414_v59 = vcombine.high %v1410_v55, %v1410_v55  ;;  %1426 = vst [vmem:[#allocation9 + $0x1f] sm:$0x1] %v1413_v58  ;;  %1429 = vst [vmem:[#allocation9 + $0x37] sm:$0x1] %v1412_v56  ;;  %p2227_p7 = por %p2226_p6, %p2225_p5 }
 0x772   :  { %1430 = vst [vmem:[#allocation9 + $0x3f] sm:$0x1] %v1414_v59  ;;  %p2228_p8 = pnand %p2227_p7, %p2221_p4 }
 0x774   :  { %2231 = shalt.err (!%p2228_p8)
}
 0x775   :  { %s2232_s15 = scalar_lea.hbm %s2631_s3, 1024 }
 0x776   :  { %p2233_p9 = scmp.ne.s32.totalorder %s2631_s3, %s2232_s15  ;;  %p2236_p10 = scmp.lt.u32.totalorder %s2232_s15, %s2631_s3 }
 0x778   :  { %p2238_p11 = pnand %p2236_p10, %p2233_p9 }
 0x77a   :  { %2241 = shalt.err (!%p2238_p11)
}
 0x77b   :  { %1444 = dma.vmem_to_hbm [thread:$0]  %s1439_s12, 1024, %s2631_s3, [#allocation5], %s2252_s1, %s2252_s1, %s2253_s11  }
 0x77c   :  { %2246 = dma.done.wait [#allocation5], 1024  }
 0x77d   :  { %2247 = vsyncadd [#allocation5], 4294966272 }
 0x77e   :  { %2248 = dma.done.wait [#allocation11], 128  }
 0x77f   :  { %2249 = vsyncadd [#allocation11], 4294967168 }
 0x780   :  { %1461 = vsyncpa [#allocation4], 1 }
 0x781   :  { %1462 = vsyncpa [#allocation7], 1 }
 0x782   :  { %1463 = vsyncpa [#allocation5], 1 }
 0x783   :  { %1464 = vsyncpa [#allocation11], 1 }

</bundles_post_ra>
